<compile_context>
chip_gen: v7x
topology: tpu7x:2x2x1
jax: 0.10.0
libtpu: 0.0.40
codegen_flags: <defaults>
</compile_context>

<pallas_src>
import numpy as np

import jax
import jax.numpy as jnp
from jax.experimental import pallas as pl

N_EMBD = 8
N_HEAD = 2
HEAD_SIZE = N_EMBD // N_HEAD          # 4
BLOCK_SIZE = 16
LANE = 128                             # lane width: one head segment per lane tile
NEG_BIG = -1e30                        # finite "-inf" for masking (NaN-safe)


def mha_kernel(x_ref, wqkv_ref, wpb_ref, mask_ref, o_ref):
    """x_ref: (B*T, C); wqkv_ref: (C, 3*H*128) lane-padded [Q|K|V, Q pre-scaled];
    wpb_ref: (H*128 + 1, 128) lane-padded per-head proj blocks + bias row;
    mask_ref: (B*T, B*T) additive mask (0 / NEG_BIG); o_ref: (B*T, 128)."""
    x = x_ref[...]                                                     # (BT, C)

    # One fused QKV projection for all heads; each head's segment is a full
    # 128-lane block, so the per-head slices below are alignment-free views.
    qkv = jnp.dot(x, wqkv_ref[...], preferred_element_type=jnp.float32)  # (BT, 6*128)

    mask_bias = mask_ref[...]                                          # (BT, BT)

    acc = None
    for h in range(N_HEAD):                                            # static unroll, H = 2
        q = qkv[:, h * LANE:(h + 1) * LANE]                            # (BT, 128)
        k = qkv[:, (N_HEAD + h) * LANE:(N_HEAD + h + 1) * LANE]        # (BT, 128)
        v = qkv[:, (2 * N_HEAD + h) * LANE:(2 * N_HEAD + h + 1) * LANE]

        # q @ k.T without a transpose: contract the (padded) head dim of both.
        s = jax.lax.dot_general(q, k, (((1,), (1,)), ((), ())),
                                preferred_element_type=jnp.float32)    # (BT, BT)
        s = s + mask_bias                                              # additive mask

        # Numerically stable softmax; divide -> exact EUP reciprocal + VPU multiply.
        s = s - jnp.max(s, axis=-1, keepdims=True)
        p = jnp.exp(s)                                 # masked entries underflow to 0
        p = p * pl.reciprocal(jnp.sum(p, axis=-1, keepdims=True), approx=False)

        pv = jnp.dot(p, v, preferred_element_type=jnp.float32)         # (BT, 128)
        # Per-head output-projection accumulation (replaces the head concat).
        contrib = jnp.dot(pv, wpb_ref[h * LANE:(h + 1) * LANE, :],
                          preferred_element_type=jnp.float32)          # (BT, 128)
        acc = contrib if acc is None else acc + contrib

    out = acc + wpb_ref[N_HEAD * LANE:N_HEAD * LANE + 1, :]            # bias row
    o_ref[...] = out.astype(o_ref.dtype)                               # lane-dense store
    # nn.Dropout(p=0) is an identity — nothing to do.


# ---------------------------------------------------------------------------
# One-off (host-side, numpy) packing — NOT in the per-call path.
# ---------------------------------------------------------------------------
def pack_weights(wq, wk, wv, wp, bp):
    """wq/wk/wv: (H, C, hs); wp: (H*hs, C); bp: (1, C) -> (w_qkv, wpb) padded."""
    C, hs, H, L = N_EMBD, HEAD_SIZE, N_HEAD, LANE
    scale = hs ** -0.5
    wq, wk, wv = np.asarray(wq), np.asarray(wk), np.asarray(wv)
    wp, bp = np.asarray(wp), np.asarray(bp)

    w_qkv = np.zeros((C, 3 * H * L), dtype=np.float32)
    for h in range(H):
        w_qkv[:, h * L: h * L + hs] = wq[h] * scale                    # Q (pre-scaled)
        w_qkv[:, (H + h) * L: (H + h) * L + hs] = wk[h]                # K
        w_qkv[:, (2 * H + h) * L: (2 * H + h) * L + hs] = wv[h]        # V

    wpb = np.zeros((H * L + 1, L), dtype=np.float32)
    for h in range(H):
        wpb[h * L: h * L + hs, :C] = wp[h * hs:(h + 1) * hs, :]        # per-head proj
    wpb[H * L, :C] = bp[0]                                             # bias row
    return jnp.asarray(w_qkv), jnp.asarray(wpb)


def build_mask_bias(B, T):
    """Block-diagonal causal additive mask over the flattened (B*T) axis."""
    bt = B * T
    row = np.arange(bt)[:, None]
    col = np.arange(bt)[None, :]
    allowed = (col <= row) & ((col // T) == (row // T))
    return jnp.asarray(np.where(allowed, 0.0, NEG_BIG).astype(np.float32))


@jax.jit
def multi_head_attention(x, w_qkv, wpb, mask_bias):
    """x: (B, T, C); pre-packed weights/mask from pack_weights/build_mask_bias."""
    B, T, C = x.shape
    x_flat = x.reshape(B * T, C)

    out_flat = pl.pallas_call(
        mha_kernel,
        out_shape=jax.ShapeDtypeStruct((B * T, LANE), jnp.float32),
        # No grid: single invocation, all operands staged whole into VMEM (< 1 MiB).
    )(x_flat, w_qkv, wpb, mask_bias)

    return out_flat[:, :C].reshape(B, T, C)


def reference_mha(x, wq, wk, wv, wp, bp):
    """Pure-JAX reference mirroring the PyTorch forward."""
    B, T, C = x.shape
    mask = jnp.tril(jnp.ones((T, T), dtype=bool))
    outs = []
    for h in range(N_HEAD):
        q = x @ wq[h]
        k = x @ wk[h]
        v = x @ wv[h]
        wei = (q @ jnp.swapaxes(k, -2, -1)) * (HEAD_SIZE ** -0.5)
        wei = jnp.where(mask, wei, -jnp.inf)
        wei = jax.nn.softmax(wei, axis=-1)
        outs.append(wei @ v)
    cat = jnp.concatenate(outs, axis=-1)
    return cat @ wp + bp


if __name__ == "__main__":
    key = jax.random.PRNGKey(0)
    kx, kq, kk, kv, kpw, kpb = jax.random.split(key, 6)

    B, T, C = 2, 8, N_EMBD   # T <= block_size (16)

    x = jax.random.normal(kx, (B, T, C), dtype=jnp.float32)

    # Deterministic parameter init (PyTorch Linear-style uniform bounds).
    bound_qkv = 1.0 / (N_EMBD ** 0.5)
    wq = jax.random.uniform(kq, (N_HEAD, C, HEAD_SIZE), jnp.float32, -bound_qkv, bound_qkv)
    wk = jax.random.uniform(kk, (N_HEAD, C, HEAD_SIZE), jnp.float32, -bound_qkv, bound_qkv)
    wv = jax.random.uniform(kv, (N_HEAD, C, HEAD_SIZE), jnp.float32, -bound_qkv, bound_qkv)

    bound_p = 1.0 / ((N_HEAD * HEAD_SIZE) ** 0.5)
    wp = jax.random.uniform(kpw, (N_HEAD * HEAD_SIZE, C), jnp.float32, -bound_p, bound_p)
    bp = jax.random.uniform(kpb, (1, C), jnp.float32, -bound_p, bound_p)

    # One-off packing (outside the jitted per-call path).
    w_qkv_packed, wpb_packed = pack_weights(wq, wk, wv, wp, bp)
    mask_bias = build_mask_bias(B, T)

    out = multi_head_attention(x, w_qkv_packed, wpb_packed, mask_bias)
    out = jax.block_until_ready(out)

    ref = reference_mha(x, wq, wk, wv, wp, bp)
    assert out.shape == (B, T, C)
    assert jnp.allclose(out, ref, atol=1e-5, rtol=1e-5), "mismatch vs reference"

    print("KERNEL_OK")
</pallas_src>

<mosaic_0001>
module attributes {stable_mosaic.version = 11 : i64} {
  func.func @mha_kernel(%arg0: memref<16x8xf32, #tpu.memory_space<vmem>>, %arg1: memref<8x768xf32, #tpu.memory_space<vmem>>, %arg2: memref<257x128xf32, #tpu.memory_space<vmem>>, %arg3: memref<16x16xf32, #tpu.memory_space<vmem>>, %arg4: memref<16x128xf32, #tpu.memory_space<vmem>>) attributes {dimension_semantics = [], scalar_prefetch = 0 : i64, scratch_operands = 0 : i64, tpu.core_type = #tpu.core_type<tc>} {
    %c0 = arith.constant 0 : index
    %c0_0 = arith.constant 0 : index
    %0 = vector.load %arg0[%c0, %c0_0] : memref<16x8xf32, #tpu.memory_space<vmem>>, vector<16x8xf32>
    %c0_1 = arith.constant 0 : index
    %c0_2 = arith.constant 0 : index
    %1 = vector.load %arg1[%c0_1, %c0_2] : memref<8x768xf32, #tpu.memory_space<vmem>>, vector<8x768xf32>
    %cst = arith.constant dense<0.000000e+00> : vector<16x768xf32>
    %2 = tpu.matmul %0, %1, %cst {dimension_numbers = #tpu.dot_dimension_numbers<[1], [0], [0], [1], [0, 0, 1, 1], [], []>} : vector<16x8xf32>, vector<8x768xf32>, vector<16x768xf32> -> vector<16x768xf32>
    %c0_3 = arith.constant 0 : index
    %c0_4 = arith.constant 0 : index
    %3 = vector.load %arg3[%c0_3, %c0_4] : memref<16x16xf32, #tpu.memory_space<vmem>>, vector<16x16xf32>
    %4 = vector.extract_strided_slice %2 {offsets = [0, 0], sizes = [16, 128], strides = [1, 1]} : vector<16x768xf32> to vector<16x128xf32>
    %5 = vector.extract_strided_slice %2 {offsets = [0, 256], sizes = [16, 128], strides = [1, 1]} : vector<16x768xf32> to vector<16x128xf32>
    %6 = vector.extract_strided_slice %2 {offsets = [0, 512], sizes = [16, 128], strides = [1, 1]} : vector<16x768xf32> to vector<16x128xf32>
    %cst_5 = arith.constant dense<0.000000e+00> : vector<16x16xf32>
    %7 = tpu.matmul %4, %5, %cst_5 {dimension_numbers = #tpu.dot_dimension_numbers<[1], [1], [0], [0], [0, 0, 1, 0], [], []>} : vector<16x128xf32>, vector<16x128xf32>, vector<16x16xf32> -> vector<16x16xf32>
    %8 = arith.addf %7, %3 : vector<16x16xf32>
    %cst_6 = arith.constant dense<0xFF800000> : vector<16xf32>
    %9 = vector.multi_reduction <maximumf>, %8, %cst_6 [1] : vector<16x16xf32> to vector<16xf32>
    %10 = vector.shape_cast %9 : vector<16xf32> to vector<16x1xf32>
    %11 = vector.broadcast %10 : vector<16x1xf32> to vector<16x16xf32>
    %12 = arith.subf %8, %11 : vector<16x16xf32>
    %13 = math.exp %12 : vector<16x16xf32>
    %cst_7 = arith.constant dense<0.000000e+00> : vector<16xf32>
    %14 = vector.multi_reduction <add>, %13, %cst_7 [1] : vector<16x16xf32> to vector<16xf32>
    %15 = vector.shape_cast %14 : vector<16xf32> to vector<16x1xf32>
    %16 = tpu.reciprocal %15 : vector<16x1xf32> -> vector<16x1xf32>
    %17 = vector.broadcast %16 : vector<16x1xf32> to vector<16x16xf32>
    %18 = arith.mulf %13, %17 : vector<16x16xf32>
    %cst_8 = arith.constant dense<0.000000e+00> : vector<16x128xf32>
    %19 = tpu.matmul %18, %6, %cst_8 {dimension_numbers = #tpu.dot_dimension_numbers<[1], [0], [0], [1], [0, 0, 1, 1], [], []>} : vector<16x16xf32>, vector<16x128xf32>, vector<16x128xf32> -> vector<16x128xf32>
    %c0_9 = arith.constant 0 : index
    %c0_10 = arith.constant 0 : index
    %20 = vector.load %arg2[%c0_9, %c0_10] : memref<257x128xf32, #tpu.memory_space<vmem>>, vector<128x128xf32>
    %cst_11 = arith.constant dense<0.000000e+00> : vector<16x128xf32>
    %21 = tpu.matmul %19, %20, %cst_11 {dimension_numbers = #tpu.dot_dimension_numbers<[1], [0], [0], [1], [0, 0, 1, 1], [], []>} : vector<16x128xf32>, vector<128x128xf32>, vector<16x128xf32> -> vector<16x128xf32>
    %22 = vector.extract_strided_slice %2 {offsets = [0, 128], sizes = [16, 128], strides = [1, 1]} : vector<16x768xf32> to vector<16x128xf32>
    %23 = vector.extract_strided_slice %2 {offsets = [0, 384], sizes = [16, 128], strides = [1, 1]} : vector<16x768xf32> to vector<16x128xf32>
    %24 = vector.extract_strided_slice %2 {offsets = [0, 640], sizes = [16, 128], strides = [1, 1]} : vector<16x768xf32> to vector<16x128xf32>
    %cst_12 = arith.constant dense<0.000000e+00> : vector<16x16xf32>
    %25 = tpu.matmul %22, %23, %cst_12 {dimension_numbers = #tpu.dot_dimension_numbers<[1], [1], [0], [0], [0, 0, 1, 0], [], []>} : vector<16x128xf32>, vector<16x128xf32>, vector<16x16xf32> -> vector<16x16xf32>
    %26 = arith.addf %25, %3 : vector<16x16xf32>
    %cst_13 = arith.constant dense<0xFF800000> : vector<16xf32>
    %27 = vector.multi_reduction <maximumf>, %26, %cst_13 [1] : vector<16x16xf32> to vector<16xf32>
    %28 = vector.shape_cast %27 : vector<16xf32> to vector<16x1xf32>
    %29 = vector.broadcast %28 : vector<16x1xf32> to vector<16x16xf32>
    %30 = arith.subf %26, %29 : vector<16x16xf32>
    %31 = math.exp %30 : vector<16x16xf32>
    %cst_14 = arith.constant dense<0.000000e+00> : vector<16xf32>
    %32 = vector.multi_reduction <add>, %31, %cst_14 [1] : vector<16x16xf32> to vector<16xf32>
    %33 = vector.shape_cast %32 : vector<16xf32> to vector<16x1xf32>
    %34 = tpu.reciprocal %33 : vector<16x1xf32> -> vector<16x1xf32>
    %35 = vector.broadcast %34 : vector<16x1xf32> to vector<16x16xf32>
    %36 = arith.mulf %31, %35 : vector<16x16xf32>
    %cst_15 = arith.constant dense<0.000000e+00> : vector<16x128xf32>
    %37 = tpu.matmul %36, %24, %cst_15 {dimension_numbers = #tpu.dot_dimension_numbers<[1], [0], [0], [1], [0, 0, 1, 1], [], []>} : vector<16x16xf32>, vector<16x128xf32>, vector<16x128xf32> -> vector<16x128xf32>
    %c128 = arith.constant 128 : index
    %c0_16 = arith.constant 0 : index
    %38 = vector.load %arg2[%c128, %c0_16] : memref<257x128xf32, #tpu.memory_space<vmem>>, vector<128x128xf32>
    %cst_17 = arith.constant dense<0.000000e+00> : vector<16x128xf32>
    %39 = tpu.matmul %37, %38, %cst_17 {dimension_numbers = #tpu.dot_dimension_numbers<[1], [0], [0], [1], [0, 0, 1, 1], [], []>} : vector<16x128xf32>, vector<128x128xf32>, vector<16x128xf32> -> vector<16x128xf32>
    %40 = arith.addf %21, %39 : vector<16x128xf32>
    %c256 = arith.constant 256 : index
    %c0_18 = arith.constant 0 : index
    %41 = vector.load %arg2[%c256, %c0_18] : memref<257x128xf32, #tpu.memory_space<vmem>>, vector<1x128xf32>
    %42 = vector.broadcast %41 : vector<1x128xf32> to vector<16x128xf32>
    %43 = arith.addf %40, %42 : vector<16x128xf32>
    %c0_19 = arith.constant 0 : index
    %c0_20 = arith.constant 0 : index
    %44 = vector.load %arg4[%c0_19, %c0_20] : memref<16x128xf32, #tpu.memory_space<vmem>>, vector<16x128xf32>
    tpu.vector_store %arg4[%c0_19, %c0_20], %43 {strides = array<i32>} : memref<16x128xf32, #tpu.memory_space<vmem>>, vector<16x128xf32>,
    return
  }
}

</mosaic_0001>

<bundles_post_ra>
// kernel: multi_head_attention.1
= control target key start
LH: loop header
LB: loop body
LE: loop exit
PB: predicated region body
PF: predicated region fallthrough
CT: control target
= control target key end

     0   :  { %9 = vsyncpa [#allocation3], 0  ;;  %s1376_s0 = inlined_call_operand.hbm [shape: f32[16,8], index: 0, kind: input, shape index: {}]   ;;  %s1377_s1 = inlined_call_operand.hbm [shape: f32[8,768], index: 1, kind: input, shape index: {}]   ;;  %s1378_s2 = inlined_call_operand.hbm [shape: f32[257,128], index: 2, kind: input, shape index: {}]   ;;  %s1379_s3 = inlined_call_operand.hbm [shape: f32[16,16], index: 3, kind: input, shape index: {}]   ;;  %s1380_s4 = inlined_call_operand.vmem [shape: f32[16,128], index: 4, kind: output, shape index: {}]  }
   0x1   :  { %10 = vsyncpa [#allocation5], 0 }
   0x2   :  { %11 = vsyncpa [#allocation8], 0  ;;  %s1233_s15 = smov [#allocation4]   ;;  %s1234_s17 = smov [#allocation2]  }
   0x3   :  { %s30_s16 = sshll.u32 %s1233_s15, 4  ;;  %s17_s18 = sshll.u32 %s1234_s17, 4  ;;  %s31_s16 = int_to_ptr.vmem [resolvable:$true] %s30_s16  ;;  %s1265_s18 = int_to_ptr.vmem [resolvable:$true] %s17_s18 }
   0x4   :  { %s1139_s21 = scalar_lea.hbm %s1377_s1, 768 }
   0x5   :  { %p1140_p0 = scmp.ne.s32.totalorder %s1377_s1, %s1139_s21  ;;  %p1143_p1 = scmp.lt.u32.totalorder %s1139_s21, %s1377_s1 }
   0x7   :  { %p1145_p2 = pnand %p1143_p1, %p1140_p0 }
   0x9   :  { %1148 = shalt.err (!%p1145_p2)
}
   0xa   :  { %s1149_s26 = scalar_lea.vmem %s31_s16, 768  ;;  %p1154_p4 = scmp.lt.s32.totalorder %s31_s16, %s31_s16 }
   0xb   :  { %p1150_p3 = scmp.ne.s32.totalorder %s31_s16, %s1149_s26  ;;  %p1155_p5 = scmp.lt.s32.totalorder %s1149_s26, %s1149_s26 }
   0xd   :  { %p1156_p6 = por %p1155_p5, %p1154_p4 }
   0xf   :  { %p1157_p7 = pnand %p1156_p6, %p1150_p3 }
  0x11   :  { %1160 = shalt.err (!%p1157_p7)
}
  0x12   :  { %33 = dma.hbm_to_vmem [thread:$0]  %s1377_s1, 768, %s31_s16, [#allocation5]  }
  0x13   :  { %s1161_s5 = scalar_lea.hbm %s1376_s0, 256 }
  0x14   :  { %p1162_p8 = scmp.ne.s32.totalorder %s1376_s0, %s1161_s5  ;;  %p1165_p9 = scmp.lt.u32.totalorder %s1161_s5, %s1376_s0 }
  0x16   :  { %p1167_p10 = pnand %p1165_p9, %p1162_p8 }
  0x18   :  { %1170 = shalt.err (!%p1167_p10)
}
  0x19   :  { %s1171_s10 = scalar_lea.vmem %s1265_s18, 256  ;;  %p1176_p12 = scmp.lt.s32.totalorder %s1265_s18, %s1265_s18 }
  0x1a   :  { %p1172_p11 = scmp.ne.s32.totalorder %s1265_s18, %s1171_s10  ;;  %p1177_p13 = scmp.lt.s32.totalorder %s1171_s10, %s1171_s10 }
  0x1c   :  { %p1178_p0 = por %p1177_p13, %p1176_p12 }
  0x1e   :  { %p1179_p1 = pnand %p1178_p0, %p1172_p11 }
  0x20   :  { %1182 = shalt.err (!%p1179_p1)
}
  0x21   :  { %s1235_s1 = smov 128   ;;  %s1236_s11 = smov 8  }
  0x22   :  { %23 = dma.hbm_to_vmem [thread:$0]  %s1376_s0, 256, %s1265_s18, [#allocation3], %s1235_s1, %s1235_s1, %s1236_s11  }
  0x23   :  { %s1237_s14 = smov [#allocation6]   ;;  %s1238_s16 = smov [#allocation7]  }
  0x24   :  { %s39_s15 = sshll.u32 %s1237_s14, 4  ;;  %s51_s17 = sshll.u32 %s1238_s16, 4  ;;  %s40_s15 = int_to_ptr.vmem [resolvable:$true] %s39_s15  ;;  %s1299_s17 = int_to_ptr.vmem [resolvable:$true] %s51_s17 }
  0x25   :  { %s1183_s21 = scalar_lea.hbm %s1378_s2, 4224 }
  0x26   :  { %p1184_p2 = scmp.ne.s32.totalorder %s1378_s2, %s1183_s21  ;;  %p1187_p3 = scmp.lt.u32.totalorder %s1183_s21, %s1378_s2 }
  0x28   :  { %p1189_p4 = pnand %p1187_p3, %p1184_p2 }
  0x2a   :  { %1192 = shalt.err (!%p1189_p4)
}
  0x2b   :  { %s1193_s0 = scalar_lea.vmem %s40_s15, 4224  ;;  %p1198_p6 = scmp.lt.s32.totalorder %s40_s15, %s40_s15 }
  0x2c   :  { %p1194_p5 = scmp.ne.s32.totalorder %s40_s15, %s1193_s0  ;;  %p1199_p7 = scmp.lt.s32.totalorder %s1193_s0, %s1193_s0 }
  0x2e   :  { %p1200_p8 = por %p1199_p7, %p1198_p6 }
  0x30   :  { %p1201_p9 = pnand %p1200_p8, %p1194_p5 }
  0x32   :  { %1204 = shalt.err (!%p1201_p9)
}
  0x33   :  { %45 = dma.hbm_to_vmem [thread:$0]  %s1378_s2, 4224, %s40_s15, [#allocation5], %s1235_s1, %s1235_s1, %s1236_s11  }
  0x34   :  { %s1205_s29 = scalar_lea.hbm %s1379_s3, 256 }
  0x35   :  { %p1206_p10 = scmp.ne.s32.totalorder %s1379_s3, %s1205_s29  ;;  %p1209_p11 = scmp.lt.u32.totalorder %s1205_s29, %s1379_s3 }
  0x37   :  { %p1211_p12 = pnand %p1209_p11, %p1206_p10 }
  0x39   :  { %1214 = shalt.err (!%p1211_p12)
}
  0x3a   :  { %s1215_s8 = scalar_lea.vmem %s1299_s17, 256  ;;  %p1220_p0 = scmp.lt.s32.totalorder %s1299_s17, %s1299_s17 }
  0x3b   :  { %p1216_p13 = scmp.ne.s32.totalorder %s1299_s17, %s1215_s8  ;;  %p1221_p1 = scmp.lt.s32.totalorder %s1215_s8, %s1215_s8 }
  0x3d   :  { %p1222_p2 = por %p1221_p1, %p1220_p0 }
  0x3f   :  { %p1223_p3 = pnand %p1222_p2, %p1216_p13 }
  0x41   :  { %1226 = shalt.err (!%p1223_p3)
}
  0x42   :  { %57 = dma.hbm_to_vmem [thread:$0]  %s1379_s3, 256, %s1299_s17, [#allocation8], %s1235_s1, %s1235_s1, %s1236_s11  }
  0x43   :  { %1227 = dma.done.wait [#allocation3], 256  }
  0x44   :  { %1228 = vsyncadd [#allocation3], 4294967040 }
  0x45   :  { %1229 = dma.done.wait [#allocation5], 4992  }
  0x46   :  { %1230 = vsyncadd [#allocation5], 4294962304 }
  0x47   :  { %1231 = dma.done.wait [#allocation8], 256  }
  0x48   :  { %1232 = vsyncadd [#allocation8], 4294967040  ;;  %v1239_v0 = vmov 0.0   ;;  %v75_v1 = vld [vmem:[#allocation4 + $0x18] sm:$0xff]  ;;  %v74_v2 = vld [vmem:[#allocation4 + $0x10] sm:$0xff]  ;;  %vm78_vm0 = vcmask 64512  }
  0x49   :  { %226 = vmatprep.mubr.f32.mxu1 %v1239_v0  ;;  %149 = vmatprep.mubr.f32.mxu0 %v1239_v0  ;;  %v70_v3 = vld [vmem:[#allocation2] sm:$0xff]  ;;  %v73_v4 = vld [vmem:[#allocation4 + $0x8] sm:$0xff]  ;;  %v72_v5 = vld [vmem:[#allocation4] sm:$0xff]  ;;  %vm393_vm1 = vcmask 130048  }
  0x4a   :  { %162 = vmatprep.subr.mxu1 %v75_v1  ;;  %85 = vmatprep.subr.mxu0 %v73_v4  ;;  %v71_v6 = vld [vmem:[#allocation2 + $0x8] sm:$0xff]  ;;  %v77_v7 = vld [vmem:[#allocation4 + $0x28] sm:$0xff]  ;;  %v76_v8 = vld [vmem:[#allocation4 + $0x20] sm:$0xff] }
  0x4b   :  { %163 = vmatpush1.msra.mxu1 %v74_v2  ;;  %86 = vmatpush1.msra.mxu0 %v72_v5  ;;  %v316_v25 = vld [vmem:[#allocation7] sm:$0xff]  ;;  %v317_v27 = vld [vmem:[#allocation7 + $0x8] sm:$0xff]  ;;  %v497_v59 = vld [vmem:[#allocation6] sm:$0xff] }
  0x4c   :  { %875 = vmatmul.mubr.msk.f32.vlgmr.msra.gmra.mrb[0].mxu1 %vm78_vm0, %v70_v3  ;;  %873 = vmatmul.mubr.msk.f32.vlgmr.msra.gmra.mrb[0].mxu0 %vm78_vm0, %v70_v3  ;;  %v498_v60 = vld [vmem:[#allocation6 + $0x8] sm:$0xff]  ;;  %v499_v62 = vld [vmem:[#allocation6 + $0x10] sm:$0xff]  ;;  %v500_v63 = vld [vmem:[#allocation6 + $0x18] sm:$0xff] }
  0x4d   :  { %232 = vmatprep.mubr.f32.mxu1 %v1239_v0  ;;  %155 = vmatprep.mubr.f32.mxu0 %v1239_v0  ;;  %v1082_v61 = vpack.c.bf16 %v498_v60, %v497_v59  ;;  %v501_v1 = vld [vmem:[#allocation6 + $0x20] sm:$0xff]  ;;  %v502_v2 = vld [vmem:[#allocation6 + $0x28] sm:$0xff]  ;;  %v503_v4 = vld [vmem:[#allocation6 + $0x30] sm:$0xff] }
  0x4e   :  { %239 = vmatprep.subr.mxu0 %v77_v7  ;;  %v504_v5 = vld [vmem:[#allocation6 + $0x38] sm:$0xff]  ;;  %v505_v7 = vld [vmem:[#allocation6 + $0x40] sm:$0xff] }
  0x4f   :  { %240 = vmatpush1.msra.mxu0 %v76_v8  ;;  %v506_v8 = vld [vmem:[#allocation6 + $0x48] sm:$0xff] }
  0x50   :  { %876 = vmatmul.mubr.msk.f32.gmra.mrb[2].mxu1 %vm78_vm0, %v71_v6  ;;  %874 = vmatmul.mubr.msk.f32.gmra.mrb[2].mxu0 %vm78_vm0, %v71_v6 }
  0x51   :  { %303 = vmatprep.mubr.f32.mxu0 %v1239_v0 }
  0x54   :  { %877 = vmatmul.mubr.msk.f32.vlgmr.msra.gmra.mrb[4].mxu0 %vm78_vm0, %v70_v3  ;;  %v1090_v3 = vpack.c.bf16 %v502_v2, %v501_v1 }
  0x55   :  { %309 = vmatprep.mubr.f32.mxu0 %v1239_v0  ;;  %v1086_v0 = vpack.c.bf16 %v500_v63, %v499_v62  ;;  %v883_v62 = vld [vmem:[#allocation6 + $0x100] ss:$0 sm:$0xff] }
  0x58   :  { %878 = vmatmul.mubr.msk.f32.gmra.mrb[6].mxu0 %vm78_vm0, %v71_v6  ;;  %v1094_v6 = vpack.c.bf16 %v504_v5, %v503_v4 }
 0x11f   :  { %v228_v9 = vpop.f32.mrb[0].mxu1  ;;  %v151_v11 = vpop.f32.mrb[0].mxu0 }
 0x120   :  { %v230_v10 = vpop.f32.mrb[1].mxu1  ;;  %v153_v12 = vpop.f32.mrb[1].mxu0  ;;  %940 = vmatprep.mubr.f32.mxu1 %v151_v11  ;;  %v508_v11 = vld [vmem:[#allocation6 + $0x58] sm:$0xff] }
 0x121   :  { %954 = vmatprep.mubr.f32.mxu0 %v153_v12 }
 0x123   :  { %v234_v13 = vpop.f32.mrb[2].mxu1  ;;  %v157_v16 = vpop.f32.mrb[2].mxu0 }
 0x124   :  { %v1034_v14 = vpack.c.bf16 %v234_v13, %v228_v9  ;;  %v236_v15 = vpop.f32.mrb[3].mxu1  ;;  %v159_v18 = vpop.f32.mrb[3].mxu0  ;;  %v1098_v9 = vpack.c.bf16 %v506_v8, %v505_v7  ;;  %v509_v13 = vld [vmem:[#allocation6 + $0x60] sm:$0xff] }
 0x125   :  { %v1042_v17 = vpack.c.bf16 %v236_v15, %v230_v10  ;;  %v507_v10 = vld [vmem:[#allocation6 + $0x50] sm:$0xff] }
 0x126   :  { %1035 = vmatprep.subr.bf16.mxu1 %v1034_v14  ;;  %v1102_v12 = vpack.c.bf16 %v508_v11, %v507_v10 }
 0x127   :  { %1037 = vmatpush3.bf16.xpose.msra.mxu1 %v1034_v14  ;;  %1043 = vmatprep.subr.bf16.mxu0 %v1042_v17  ;;  %v305_v19 = vpop.f32.mrb[4].mxu0  ;;  %v510_v14 = vld [vmem:[#allocation6 + $0x68] sm:$0xff] }
 0x128   :  { %1045 = vmatpush3.bf16.xpose.msra.mxu0 %v1042_v17  ;;  %v307_v20 = vpop.f32.mrb[5].mxu0  ;;  %v1106_v15 = vpack.c.bf16 %v510_v14, %v509_v13  ;;  %v512_v17 = vld [vmem:[#allocation6 + $0x78] sm:$0xff] }
 0x129   :  { %1083 = vmatprep.subr.bf16.mxu0 %v1082_v61 }
 0x12b   :  { %v311_v21 = vpop.f32.mrb[6].mxu0 }
 0x12c   :  { %v1038_v22 = vpack.c.bf16 %v311_v21, %v305_v19  ;;  %v313_v23 = vpop.f32.mrb[7].mxu0 }
 0x12d   :  { %v1342_v24 = vpack.c.bf16 %v313_v23, %v307_v20 }
 0x12e   :  { %941 = vmatmul.mubr.f32.vlgmr.msra.gmra.mrb[4].mxu1 %v157_v16  ;;  %1039 = vmatprep.subr.bf16.mxu1 %v1038_v22  ;;  %v511_v16 = vld [vmem:[#allocation6 + $0x70] sm:$0xff] }
 0x12f   :  { %955 = vmatmul.mubr.f32.vlgmr.msra.gmra.mrb[8].mxu0 %v159_v18  ;;  %1041 = vmatpush3.bf16.msra.mxu1 %v1038_v22  ;;  %v1110_v18 = vpack.c.bf16 %v512_v17, %v511_v16 }
 0x130   :  { %1047 = vmatprep.subr.bf16.mxu1 %v1342_v24  ;;  %1085 = vmatpush3.bf16.msra.mxu0 %v1082_v61 }
 0x131   :  { %1087 = vmatprep.subr.bf16.mxu0 %v1086_v0 }
 0x134   :  { %1089 = vmatpush3.bf16.msra.mxu0 %v1086_v0 }
 0x135   :  { %1091 = vmatprep.subr.bf16.mxu0 %v1090_v3 }
 0x138   :  { %1093 = vmatpush3.bf16.msra.mxu0 %v1090_v3 }
 0x139   :  { %1095 = vmatprep.subr.bf16.mxu0 %v1094_v6 }
 0x13c   :  { %1097 = vmatpush3.bf16.msra.mxu0 %v1094_v6 }
 0x13d   :  { %1099 = vmatprep.subr.bf16.mxu0 %v1098_v9 }
 0x140   :  { %1101 = vmatpush3.bf16.msra.mxu0 %v1098_v9 }
 0x141   :  { %1103 = vmatprep.subr.bf16.mxu0 %v1102_v12 }
 0x144   :  { %1105 = vmatpush3.bf16.msra.mxu0 %v1102_v12 }
 0x145   :  { %1107 = vmatprep.subr.bf16.mxu0 %v1106_v15 }
 0x148   :  { %1109 = vmatpush3.bf16.msra.mxu0 %v1106_v15 }
 0x149   :  { %1111 = vmatprep.subr.bf16.mxu0 %v1110_v18 }
 0x14c   :  { %1113 = vmatpush3.bf16.msra.mxu0 %v1110_v18 }
 0x201   :  { %v942_v26 = vpop.f32.mrb[4].mxu1 }
 0x202   :  { %v384_v28 = vpop.f32.mrb[5].mxu1  ;;  %v956_v29 = vpop.f32.mrb[8].mxu0  ;;  %v390_v33 = vadd.f32 %v942_v26, %v317_v27  ;;  %v691_v26 = vld [vmem:[#allocation6 + $0x80] sm:$0xff] }
 0x203   :  { %v385_v30 = vadd.f32 %v384_v28, %v316_v25  ;;  %v579_v31 = vpop.f32.mrb[9].mxu0  ;;  %v585_v35 = vadd.f32 %v956_v29, %v317_v27  ;;  %v692_v27 = vld [vmem:[#allocation6 + $0x88] sm:$0xff] }
 0x204   :  { %v580_v32 = vadd.f32 %v579_v31, %v316_v25  ;;  %v397_v37 = vsel %vm393_vm1, %v390_v33, -inf }
 0x205   :  { %v394_v34 = vsel %vm393_vm1, %v385_v30, -inf  ;;  %v591_v38 = vsel %vm393_vm1, %v585_v35, -inf }
 0x206   :  { %395 = vmax.xlane.f32.xlu0 %v394_v34  ;;  %v588_v36 = vsel %vm393_vm1, %v580_v32, -inf  ;;  %v694_v34 = vld [vmem:[#allocation6 + $0x98] sm:$0xff] }
 0x207   :  { %589 = vmax.xlane.f32.xlu1 %v588_v36 }
 0x20a   :  { %398 = vmax.xlane.f32.xlu0 %v397_v37 }
 0x20b   :  { %592 = vmax.xlane.f32.xlu1 %v591_v38  ;;  %v695_v38 = vld [vmem:[#allocation6 + $0xa0] sm:$0xff] }
 0x293   :  { %v396_v39 = vpop.xlane.xlu0 %395 }
 0x294   :  { %v400_v40 = vsub.f32 %v385_v30, %v396_v39  ;;  %v590_v41 = vpop.xlane.xlu1 %589  ;;  %v696_v39 = vld [vmem:[#allocation6 + $0xa8] sm:$0xff] }
 0x295   :  { %v594_v42 = vsub.f32 %v580_v32, %v590_v41  ;;  %v1050_v32 = vpack.c.bf16 %v692_v27, %v691_v26  ;;  %v697_v41 = vld [vmem:[#allocation6 + $0xb0] sm:$0xff] }
 0x296   :  { %v402_v43 = vmul.f32 1.442695, %v400_v40  ;;  %v1058_v40 = vpack.c.bf16 %v696_v39, %v695_v38 }
 0x297   :  { %v596_v44 = vmul.f32 1.442695, %v594_v42  ;;  %v399_v45 = vpop.xlane.xlu0 %398  ;;  %v698_v42 = vld [vmem:[#allocation6 + $0xb8] sm:$0xff] }
 0x298   :  { %1123 = vpow2.f32 %v402_v43  ;;  %v401_v46 = vsub.f32 %v390_v33, %v399_v45  ;;  %v593_v47 = vpop.xlane.xlu1 %592  ;;  %v693_v33 = vld [vmem:[#allocation6 + $0x90] sm:$0xff]  ;;  %v1062_v43 = vpack.c.bf16 %v698_v42, %v697_v41  ;;  %v700_v45 = vld [vmem:[#allocation6 + $0xc8] sm:$0xff] }
 0x299   :  { %v595_v48 = vsub.f32 %v585_v35, %v593_v47  ;;  %1125 = vpow2.f32 %v596_v44  ;;  %v1054_v37 = vpack.c.bf16 %v694_v34, %v693_v33  ;;  %v699_v44 = vld [vmem:[#allocation6 + $0xc0] sm:$0xff]  ;;  %v702_v47 = vld [vmem:[#allocation6 + $0xd8] sm:$0xff] }
 0x29a   :  { %v404_v49 = vmul.f32 1.442695, %v401_v46  ;;  %v701_v46 = vld [vmem:[#allocation6 + $0xd0] sm:$0xff] }
 0x29b   :  { %v598_v50 = vmul.f32 1.442695, %v595_v48  ;;  %v1070_v48 = vpack.c.bf16 %v702_v47, %v701_v46 }
 0x29c   :  { %1127 = vpow2.f32 %v404_v49  ;;  %v703_v49 = vld [vmem:[#allocation6 + $0xe0] sm:$0xff] }
 0x29d   :  { %1129 = vpow2.f32 %v598_v50  ;;  %v704_v50 = vld [vmem:[#allocation6 + $0xe8] sm:$0xff] }
 0x2a2   :  { %v1124_v51 = vpop.eup %1123 }
 0x2a3   :  { %v406_v52 = vsel %vm393_vm1, %v1124_v51, 0.0  ;;  %v1350_v53 = vpop.eup %1125 }
 0x2a4   :  { %407 = vadd.xlane.f32.xlu0 %v406_v52  ;;  %v600_v56 = vsel %vm393_vm1, %v1350_v53, 0.0  ;;  %v705_v52 = vld [vmem:[#allocation6 + $0xf0] sm:$0xff] }
 0x2a6   :  { %v1352_v54 = vpop.eup %1127 }
 0x2a7   :  { %v409_v55 = vsel %vm393_vm1, %v1352_v54, 0.0  ;;  %v1358_v57 = vpop.eup %1129 }
 0x2a8   :  { %410 = vadd.xlane.f32.xlu1 %v409_v55  ;;  %601 = vadd.xlane.f32.xlu0 %v600_v56  ;;  %v603_v58 = vsel %vm393_vm1, %v1358_v57, 0.0 }
 0x2ac   :  { %604 = vadd.xlane.f32.xlu1 %v603_v58 }
 0x331   :  { %v408_v19 = vpop.xlane.xlu0 %407 }
 0x332   :  { %1131 = vrcp.f32 %v408_v19 }
 0x335   :  { %v602_v20 = vpop.xlane.xlu0 %601  ;;  %v411_v21 = vpop.xlane.xlu1 %410 }
 0x336   :  { %1133 = vrcp.f32 %v602_v20 }
 0x337   :  { %1135 = vrcp.f32 %v411_v21 }
 0x339   :  { %v605_v22 = vpop.xlane.xlu1 %604 }
 0x33a   :  { %1137 = vrcp.f32 %v605_v22 }
 0x33c   :  { %v1132_v23 = vpop.eup %1131 }
 0x33d   :  { %v414_v25 = vmul.f32 %v1132_v23, %v1124_v51  ;;  %v1074_v51 = vpack.c.bf16 %v704_v50, %v703_v49 }
 0x33f   :  { %947 = vmatprep.mubr.msk.f32.mxu1 %vm393_vm1, %v414_v25 }
 0x340   :  { %v1134_v28 = vpop.eup %1133 }
 0x341   :  { %v1136_v29 = vpop.eup %1135  ;;  %v608_v30 = vmul.f32 %v1134_v28, %v1350_v53  ;;  %v706_v53 = vld [vmem:[#allocation6 + $0xf8] sm:$0xff] }
 0x342   :  { %v415_v31 = vmul.f32 %v1136_v29, %v1352_v54  ;;  %v1078_v54 = vpack.c.bf16 %v706_v53, %v705_v52 }
 0x344   :  { %v1138_v35 = vpop.eup %1137  ;;  %948 = vmatmul.mubr.msk.f32.vlgmr.msra.gmra.mrb[6].mxu1 %vm393_vm1, %v415_v31 }
 0x345   :  { %v609_v36 = vmul.f32 %v1138_v35, %v1358_v57  ;;  %1049 = vmatpush3.bf16.msra.mxu1 %v1342_v24  ;;  %961 = vmatprep.mubr.msk.f32.mxu1 %vm393_vm1, %v608_v30  ;;  %v1066_v24 = vpack.c.bf16 %v700_v45, %v699_v44 }
 0x346   :  { %1051 = vmatprep.subr.bf16.mxu1 %v1050_v32 }
 0x348   :  { %962 = vmatmul.mubr.msk.f32.vlgmr.msra.gmra.mrb[8].mxu1 %vm393_vm1, %v609_v36 }
 0x349   :  { %1053 = vmatpush3.bf16.msra.mxu1 %v1050_v32 }
 0x34a   :  { %1055 = vmatprep.subr.bf16.mxu1 %v1054_v37 }
 0x34d   :  { %1057 = vmatpush3.bf16.msra.mxu1 %v1054_v37 }
 0x34e   :  { %1059 = vmatprep.subr.bf16.mxu1 %v1058_v40 }
 0x351   :  { %1061 = vmatpush3.bf16.msra.mxu1 %v1058_v40 }
 0x352   :  { %1063 = vmatprep.subr.bf16.mxu1 %v1062_v43 }
 0x355   :  { %1065 = vmatpush3.bf16.msra.mxu1 %v1062_v43 }
 0x356   :  { %1067 = vmatprep.subr.bf16.mxu1 %v1066_v24 }
 0x359   :  { %1069 = vmatpush3.bf16.msra.mxu1 %v1066_v24 }
 0x35a   :  { %1071 = vmatprep.subr.bf16.mxu1 %v1070_v48 }
 0x35d   :  { %1073 = vmatpush3.bf16.msra.mxu1 %v1070_v48 }
 0x35e   :  { %1075 = vmatprep.subr.bf16.mxu1 %v1074_v51 }
 0x361   :  { %1077 = vmatpush3.bf16.msra.mxu1 %v1074_v51 }
 0x362   :  { %1079 = vmatprep.subr.bf16.mxu1 %v1078_v54 }
 0x365   :  { %1081 = vmatpush3.bf16.msra.mxu1 %v1078_v54 }
 0x417   :  { %v949_v55 = vpop.f32.mrb[6].mxu1 }
 0x418   :  { %v488_v56 = vpop.f32.mrb[7].mxu1 }
 0x419   :  { %1031 = vmatprep.mubr.f32.mxu0 %v488_v56 }
 0x41a   :  { %1032 = vmatmul.mubr.f32.vlgmr.msra.gmra.mrb[10].mxu0 %v949_v55 }
 0x41b   :  { %v963_v57 = vpop.f32.mrb[8].mxu1 }
 0x41c   :  { %v682_v58 = vpop.f32.mrb[9].mxu1 }
 0x41d   :  { %996 = vmatprep.mubr.f32.mxu1 %v682_v58 }
 0x41e   :  { %997 = vmatmul.mubr.f32.vlgmr.msra.gmra.mrb[10].mxu1 %v963_v57 }
 0x4ed   :  { %v1033_v59 = vpop.f32.mrb[10].mxu0 }
 0x4ee   :  { %v848_v60 = vpop.f32.mrb[11].mxu0 }
 0x4f1   :  { %v998_v61 = vpop.f32.mrb[10].mxu1 }
 0x4f2   :  { %v854_v63 = vadd.f32 %v1033_v59, %v998_v61  ;;  %v773_v0 = vpop.f32.mrb[11].mxu1 }
 0x4f3   :  { %v849_v1 = vadd.f32 %v848_v60, %v773_v0 }
 0x4f4   :  { %v863_v2 = vadd.f32 %v883_v62, %v854_v63 }
 0x4f5   :  { %v862_v3 = vadd.f32 %v883_v62, %v849_v1 }
 0x4f6   :  { %865 = vst [vmem:[%s1380_s4 + $0x8] sm:$0xff] %v863_v2 }
 0x4f7   :  { %864 = vst [vmem:[%s1380_s4] sm:$0xff] %v862_v3 }
 0x4f8   :  { %870 = vsyncpa [#allocation3], 1 }
 0x4f9   :  { %871 = vsyncpa [#allocation5], 1 }
 0x4fa   :  { %872 = vsyncpa [#allocation8], 1 }

</bundles_post_ra>
